<compile_context>
chip_gen: v7x
topology: tpu7x:2x2x1
jax: 0.10.0
libtpu: 0.0.40
codegen_flags: <defaults>
</compile_context>

<pallas_src>
import functools

import jax
import jax.numpy as jnp
import numpy as np
from jax.experimental import pallas as pl
from jax.experimental.pallas import tpu as pltpu

_LANE = 128      # lanes per vreg (fast axis)
_SUBLANE = 8     # sublanes per vreg (slow axis)


def _fir_kernel(w_ref, x_ref, out_ref, *, taps_per_phase, phase_taps, col_chunk):
    """One (R_blk, C) block of outputs.

    w_ref  : (n_phases * taps_per_phase,)  polyphase taps in SMEM (scalars)
    x_ref  : (n_phases, R_blk, C + H)      lane-extended rows (main | halo) per phase
    out_ref: (R_blk, C)
    """
    R, C = out_ref.shape
    n_phases = len(phase_taps)

    # Hoist all scalar tap reads out of the column-chunk loop; zero taps are
    # statically skipped via phase_taps.
    taps = [(r, q, w_ref[r * taps_per_phase + q])
            for r in range(n_phases) for q in range(phase_taps[r])]

    for c0 in range(0, C, col_chunk):                 # static unroll over column chunks
        accs = [None, None]                           # two interleaved accumulators
        for t, (r, q, w) in enumerate(taps):          # static unroll over taps (VPU)
            # Contiguous lane slice straight from the input ref (no scratch copy).
            seg = x_ref[r, :, c0 + q:c0 + q + col_chunk]
            term = w * seg
            k = t & 1
            accs[k] = term if accs[k] is None else accs[k] + term
        acc = accs[0] if accs[1] is None else accs[0] + accs[1]
        out_ref[:, c0:c0 + col_chunk] = acc.astype(out_ref.dtype)   # lane-aligned store


def fir_filter(x, weights, stride: int = 1, *, block_cols: int = 4096,
               max_block_rows: int = 256):
    """JAX/Pallas equivalent of FIRfilter.forward.  x: (N,), weights: (L,) -> (Nout,)."""
    s = int(stride)
    L = int(weights.shape[0])
    N = int(x.shape[0])
    pad_left = (L - 1) // 2
    pad_right = (L - L % 2) // 2
    npad = N + pad_left + pad_right
    nout = (npad - L) // s + 1
    qmax = pl.cdiv(L, s)                                   # taps per polyphase branch
    # valid (non-zero) tap count per phase; skips dead taps when L % s != 0
    phase_taps = tuple((L - r + s - 1) // s if r < L else 0 for r in range(s))

    # ---- geometry -----------------------------------------------------------
    H = _LANE * pl.cdiv(qmax, _LANE)                       # halo lanes per row (>= qmax-1)
    C = min(block_cols, _LANE * pl.cdiv(nout, _LANE))      # lanes per output row
    C = max(C, _LANE)
    rows_needed = pl.cdiv(nout, C)
    rows_cap = max(_SUBLANE, _SUBLANE * (max_block_rows // (_SUBLANE * s)))
    R_blk = min(rows_cap, _SUBLANE * pl.cdiv(rows_needed, _SUBLANE))
    # keep >= 2 grid blocks when there is enough work (feeds both TCs on v7x)
    if rows_needed > _SUBLANE and pl.cdiv(rows_needed, R_blk) < 2:
        R_blk = _SUBLANE * pl.cdiv(pl.cdiv(rows_needed, 2), _SUBLANE)
    n_blocks = pl.cdiv(rows_needed, R_blk)
    Rtot = R_blk * n_blocks
    phase_len = Rtot * C + H                               # samples needed per phase
    col_chunk = 512 if C % 512 == 0 else (256 if C % 256 == 0 else _LANE)

    # ---- lane-extended polyphase layout (single fused pad/slice/concat pass) ----
    xf = x.astype(jnp.float32)
    total = s * phase_len
    xbig = jnp.pad(xf, (pad_left, total - N - pad_left))   # zero fill incl. halo tail
    halo_idx = ((jnp.arange(Rtot, dtype=jnp.int32)[:, None] + 1) * C
                + jnp.arange(H, dtype=jnp.int32)[None, :]).reshape(-1)   # (Rtot*H,)
    if s == 1:
        main = xbig[:Rtot * C].reshape(Rtot, C)
        halo = jnp.take(xbig, halo_idx, axis=0).reshape(Rtot, H)
        x_ext = jnp.concatenate([main, halo], axis=1)[None]              # (1, Rtot, C+H)
    else:
        ph = xbig.reshape(phase_len, s)                    # time-major, phase-minor (view)
        main = ph[:Rtot * C].reshape(Rtot, C, s)
        halo = jnp.take(ph, halo_idx, axis=0).reshape(Rtot, H, s)
        # one de-interleave transpose at the end of the chain
        x_ext = jnp.transpose(jnp.concatenate([main, halo], axis=1), (2, 0, 1))

    # polyphase-reordered, flipped taps: w_poly[r*qmax + q] = flip(w)[q*s + r]  (0-padded)
    wflip = jnp.flip(weights.astype(jnp.float32))
    kk = jnp.arange(qmax)[None, :] * s + jnp.arange(s)[:, None]          # (s, qmax)
    w_poly = jnp.where(kk < L, wflip[jnp.minimum(kk, L - 1)],
                       jnp.float32(0.0)).reshape(-1)

    out2d = pl.pallas_call(
        functools.partial(_fir_kernel, taps_per_phase=qmax,
                          phase_taps=phase_taps, col_chunk=col_chunk),
        out_shape=jax.ShapeDtypeStruct((Rtot, C), jnp.float32),
        grid=(n_blocks,),
        in_specs=[
            pl.BlockSpec(memory_space=pltpu.MemorySpace.SMEM),           # taps -> SMEM scalars
            pl.BlockSpec((s, R_blk, C + H), lambda i: (0, i, 0)),        # lane-extended rows
        ],
        out_specs=pl.BlockSpec((R_blk, C), lambda i: (i, 0)),            # lane-dense output
        compiler_params=pltpu.CompilerParams(
            dimension_semantics=("parallel",),       # shard row-blocks across TCs on v7x
            vmem_limit_bytes=48 * 1024 * 1024,       # fits v7x 64 MiB; plenty on v5e/v6e
        ),
    )(w_poly, x_ext)

    out = out2d.reshape(-1)                          # free (contiguous) reshape
    # Tail slice only when padding rows/cols actually exist (avoids an extra copy
    # when nout happens to fill the padded layout exactly).
    return out if out.shape[0] == nout else out[:nout]


if __name__ == "__main__":
    # Deterministic setup consistent with FIRfilter.__init__(filter_length=9)
    filter_length = 9
    N = 128

    key = jax.random.PRNGKey(0)
    kx, kw = jax.random.split(key)
    x = jax.random.normal(kx, (N,), dtype=jnp.float32)

    # __init__ default: delta filter (zeros with a 1.0 at filter_length // 2)
    w_np = np.zeros((filter_length,), dtype=np.float32)
    w_np[filter_length // 2] = 1.0
    w_delta = jnp.asarray(w_np)
    w_rand = jax.random.normal(kw, (filter_length,), dtype=jnp.float32)

    def reference(x, w, stride):
        L = int(w.shape[0])
        pl_, pr_ = (L - 1) // 2, (L - L % 2) // 2
        xp = jnp.pad(x, (pl_, pr_))
        wf = jnp.flip(w)
        nout = (xp.shape[0] - L) // stride + 1
        return jnp.stack(
            [jnp.sum(xp[i * stride:i * stride + L] * wf) for i in range(nout)]
        )

    for stride in (1, 2):
        for w in (w_delta, w_rand):
            out = jax.block_until_ready(fir_filter(x, w, stride=stride))
            ref = reference(x, w, stride)
            assert out.shape == ref.shape, (stride, out.shape, ref.shape)
            np.testing.assert_allclose(np.asarray(out), np.asarray(ref),
                                       rtol=1e-5, atol=1e-5)

    print("KERNEL_OK")
</pallas_src>

<mosaic_0001>
module attributes {stable_mosaic.version = 11 : i64} {
  func.func @_fir_kernel(%arg0: i32, %arg1: memref<9xf32, #tpu.memory_space<smem>>, %arg2: memref<1x8x256xf32, #tpu.memory_space<vmem>>, %arg3: memref<8x128xf32, #tpu.memory_space<vmem>>) attributes {dimension_semantics = [#tpu.dimension_semantics<parallel>], iteration_bounds = array<i64: 1>, scalar_prefetch = 0 : i64, scratch_operands = 0 : i64, tpu.core_type = #tpu.core_type<tc>, window_params = [{transform_indices = @transform_0, window_bounds = array<i64: 9>}, {transform_indices = @transform_1, window_bounds = array<i64: 1, 8, 256>}, {transform_indices = @transform_2, window_bounds = array<i64: 8, 128>}]} {
    %c0 = arith.constant 0 : index
    %0 = memref.load %arg1[%c0] : memref<9xf32, #tpu.memory_space<smem>>
    %c1 = arith.constant 1 : index
    %1 = memref.load %arg1[%c1] : memref<9xf32, #tpu.memory_space<smem>>
    %c2 = arith.constant 2 : index
    %2 = memref.load %arg1[%c2] : memref<9xf32, #tpu.memory_space<smem>>
    %c3 = arith.constant 3 : index
    %3 = memref.load %arg1[%c3] : memref<9xf32, #tpu.memory_space<smem>>
    %c4 = arith.constant 4 : index
    %4 = memref.load %arg1[%c4] : memref<9xf32, #tpu.memory_space<smem>>
    %c5 = arith.constant 5 : index
    %5 = memref.load %arg1[%c5] : memref<9xf32, #tpu.memory_space<smem>>
    %c6 = arith.constant 6 : index
    %6 = memref.load %arg1[%c6] : memref<9xf32, #tpu.memory_space<smem>>
    %c7 = arith.constant 7 : index
    %7 = memref.load %arg1[%c7] : memref<9xf32, #tpu.memory_space<smem>>
    %c8 = arith.constant 8 : index
    %8 = memref.load %arg1[%c8] : memref<9xf32, #tpu.memory_space<smem>>
    %c0_0 = arith.constant 0 : index
    %c0_1 = arith.constant 0 : index
    %c0_2 = arith.constant 0 : index
    %9 = vector.load %arg2[%c0_0, %c0_1, %c0_2] : memref<1x8x256xf32, #tpu.memory_space<vmem>>, vector<1x8x128xf32>
    %10 = vector.shape_cast %9 : vector<1x8x128xf32> to vector<8x128xf32>
    %11 = vector.broadcast %0 : f32 to vector<8x128xf32>
    %12 = arith.mulf %11, %10 : vector<8x128xf32>
    %c0_3 = arith.constant 0 : index
    %c0_4 = arith.constant 0 : index
    %c1_5 = arith.constant 1 : index
    %13 = vector.load %arg2[%c0_3, %c0_4, %c1_5] : memref<1x8x256xf32, #tpu.memory_space<vmem>>, vector<1x8x128xf32>
    %14 = vector.shape_cast %13 : vector<1x8x128xf32> to vector<8x128xf32>
    %15 = vector.broadcast %1 : f32 to vector<8x128xf32>
    %16 = arith.mulf %15, %14 : vector<8x128xf32>
    %c0_6 = arith.constant 0 : index
    %c0_7 = arith.constant 0 : index
    %c2_8 = arith.constant 2 : index
    %17 = vector.load %arg2[%c0_6, %c0_7, %c2_8] : memref<1x8x256xf32, #tpu.memory_space<vmem>>, vector<1x8x128xf32>
    %18 = vector.shape_cast %17 : vector<1x8x128xf32> to vector<8x128xf32>
    %19 = vector.broadcast %2 : f32 to vector<8x128xf32>
    %20 = arith.mulf %19, %18 : vector<8x128xf32>
    %21 = arith.addf %12, %20 : vector<8x128xf32>
    %c0_9 = arith.constant 0 : index
    %c0_10 = arith.constant 0 : index
    %c3_11 = arith.constant 3 : index
    %22 = vector.load %arg2[%c0_9, %c0_10, %c3_11] : memref<1x8x256xf32, #tpu.memory_space<vmem>>, vector<1x8x128xf32>
    %23 = vector.shape_cast %22 : vector<1x8x128xf32> to vector<8x128xf32>
    %24 = vector.broadcast %3 : f32 to vector<8x128xf32>
    %25 = arith.mulf %24, %23 : vector<8x128xf32>
    %26 = arith.addf %16, %25 : vector<8x128xf32>
    %c0_12 = arith.constant 0 : index
    %c0_13 = arith.constant 0 : index
    %c4_14 = arith.constant 4 : index
    %27 = vector.load %arg2[%c0_12, %c0_13, %c4_14] : memref<1x8x256xf32, #tpu.memory_space<vmem>>, vector<1x8x128xf32>
    %28 = vector.shape_cast %27 : vector<1x8x128xf32> to vector<8x128xf32>
    %29 = vector.broadcast %4 : f32 to vector<8x128xf32>
    %30 = arith.mulf %29, %28 : vector<8x128xf32>
    %31 = arith.addf %21, %30 : vector<8x128xf32>
    %c0_15 = arith.constant 0 : index
    %c0_16 = arith.constant 0 : index
    %c5_17 = arith.constant 5 : index
    %32 = vector.load %arg2[%c0_15, %c0_16, %c5_17] : memref<1x8x256xf32, #tpu.memory_space<vmem>>, vector<1x8x128xf32>
    %33 = vector.shape_cast %32 : vector<1x8x128xf32> to vector<8x128xf32>
    %34 = vector.broadcast %5 : f32 to vector<8x128xf32>
    %35 = arith.mulf %34, %33 : vector<8x128xf32>
    %36 = arith.addf %26, %35 : vector<8x128xf32>
    %c0_18 = arith.constant 0 : index
    %c0_19 = arith.constant 0 : index
    %c6_20 = arith.constant 6 : index
    %37 = vector.load %arg2[%c0_18, %c0_19, %c6_20] : memref<1x8x256xf32, #tpu.memory_space<vmem>>, vector<1x8x128xf32>
    %38 = vector.shape_cast %37 : vector<1x8x128xf32> to vector<8x128xf32>
    %39 = vector.broadcast %6 : f32 to vector<8x128xf32>
    %40 = arith.mulf %39, %38 : vector<8x128xf32>
    %41 = arith.addf %31, %40 : vector<8x128xf32>
    %c0_21 = arith.constant 0 : index
    %c0_22 = arith.constant 0 : index
    %c7_23 = arith.constant 7 : index
    %42 = vector.load %arg2[%c0_21, %c0_22, %c7_23] : memref<1x8x256xf32, #tpu.memory_space<vmem>>, vector<1x8x128xf32>
    %43 = vector.shape_cast %42 : vector<1x8x128xf32> to vector<8x128xf32>
    %44 = vector.broadcast %7 : f32 to vector<8x128xf32>
    %45 = arith.mulf %44, %43 : vector<8x128xf32>
    %46 = arith.addf %36, %45 : vector<8x128xf32>
    %c0_24 = arith.constant 0 : index
    %c0_25 = arith.constant 0 : index
    %c8_26 = arith.constant 8 : index
    %47 = vector.load %arg2[%c0_24, %c0_25, %c8_26] : memref<1x8x256xf32, #tpu.memory_space<vmem>>, vector<1x8x128xf32>
    %48 = vector.shape_cast %47 : vector<1x8x128xf32> to vector<8x128xf32>
    %49 = vector.broadcast %8 : f32 to vector<8x128xf32>
    %50 = arith.mulf %49, %48 : vector<8x128xf32>
    %51 = arith.addf %41, %50 : vector<8x128xf32>
    %52 = arith.addf %51, %46 : vector<8x128xf32>
    %c0_27 = arith.constant 0 : index
    %c0_28 = arith.constant 0 : index
    %53 = vector.load %arg3[%c0_27, %c0_28] : memref<8x128xf32, #tpu.memory_space<vmem>>, vector<8x128xf32>
    tpu.vector_store %arg3[%c0_27, %c0_28], %52 {strides = array<i32>} : memref<8x128xf32, #tpu.memory_space<vmem>>, vector<8x128xf32>,
    return
  }
  func.func @transform_0(%arg0: i32) -> i32 {
    %c0_i32 = arith.constant 0 : i32
    %c0_i32_0 = arith.constant 0 : i32
    return %c0_i32 : i32
  }
  func.func @transform_1(%arg0: i32) -> (i32, i32, i32) {
    %c0_i32 = arith.constant 0 : i32
    %c0_i32_0 = arith.constant 0 : i32
    %c0_i32_1 = arith.constant 0 : i32
    return %c0_i32, %arg0, %c0_i32_0 : i32, i32, i32
  }
  func.func @transform_2(%arg0: i32) -> (i32, i32) {
    %c0_i32 = arith.constant 0 : i32
    %c0_i32_0 = arith.constant 0 : i32
    return %arg0, %c0_i32 : i32, i32
  }
}

</mosaic_0001>

<bundles_post_ra>
// kernel: tpu_custom_call.1
= control target key start
LH: loop header
LB: loop body
LE: loop exit
PB: predicated region body
PF: predicated region fallthrough
CT: control target
= control target key end

     0   :  { %7 = vsyncpa [#allocation5], 0  ;;  %s325_s0 = inlined_call_operand.hbm [shape: f32[9], index: 0, kind: input, shape index: {}]   ;;  %s326_s1 = inlined_call_operand.hbm [shape: f32[1,8,256], index: 1, kind: input, shape index: {}]   ;;  %s327_s2 = inlined_call_operand.hbm [shape: f32[8,128], index: 2, kind: output, shape index: {}]  }
   0x1   :  { %8 = vsyncpa [#allocation3], 0 }
   0x2   :  { %9 = vsyncpa [#allocation4], 0  ;;  %s189_s11 = scalar_lea.hbm %s325_s0, 16 }
   0x3   :  { %p190_p0 = scmp.ne.s32.totalorder %s325_s0, %s189_s11  ;;  %p193_p1 = scmp.lt.u32.totalorder %s189_s11, %s325_s0 }
   0x5   :  { %p195_p2 = pnand %p193_p1, %p190_p0 }
   0x7   :  { %198 = shalt.err (!%p195_p2)
}
   0x8   :  { %s249_s16 = smov [#allocation2]   ;;  %s250_s19 = smov [#allocation6]  }
   0x9   :  { %17 = dma.hbm_to_smem %s325_s0, 16, %s249_s16, [#allocation5]  }
   0xa   :  { %s24_s20 = sshll.u32 %s250_s19, 4  ;;  %s199_s23 = scalar_lea.hbm %s326_s1, 256  ;;  %s25_s20 = int_to_ptr.vmem [resolvable:$true] %s24_s20 }
   0xb   :  { %p200_p3 = scmp.ne.s32.totalorder %s326_s1, %s199_s23  ;;  %p203_p4 = scmp.lt.u32.totalorder %s199_s23, %s326_s1 }
   0xd   :  { %p205_p5 = pnand %p203_p4, %p200_p3 }
   0xf   :  { %208 = shalt.err (!%p205_p5)
}
  0x10   :  { %s209_s28 = scalar_lea.vmem %s25_s20, 256  ;;  %p214_p7 = scmp.lt.s32.totalorder %s25_s20, %s25_s20 }
  0x11   :  { %p210_p6 = scmp.ne.s32.totalorder %s25_s20, %s209_s28  ;;  %p215_p8 = scmp.lt.s32.totalorder %s209_s28, %s209_s28 }
  0x13   :  { %p216_p9 = por %p215_p8, %p214_p7 }
  0x15   :  { %p217_p10 = pnand %p216_p9, %p210_p6 }
  0x17   :  { %220 = shalt.err (!%p217_p10)
}
  0x18   :  { %27 = dma.hbm_to_vmem [thread:$0]  %s326_s1, 256, %s25_s20, [#allocation3]  }
  0x19   :  { %243 = dma.done.wait [#allocation5], 16  }
  0x1a   :  { %244 = vsyncadd [#allocation5], 4294967280 }
  0x1b   :  { %245 = dma.done.wait [#allocation3], 256  }
  0x1c   :  { %246 = vsyncadd [#allocation3], 4294967040 }
  0x1d   :  { %34 = sfence }
  0x1e   :  { %s177_s30 = sld [smem:[#allocation2 + $0x5]]  ;;  %s175_s3 = sld [smem:[#allocation2 + $0x3]]  ;;  %v296_v0 = vld [vmem:[#allocation6] sm:$0xff]  ;;  %v48_v1 = vld [vmem:[#allocation6 + $0x8] sm:$0xff]  ;;  %vm61_vm0 = vcmask 1031168   ;;  %vm88_vm1 = vcmask 1014784  }
  0x1f   :  { %s179_s4 = sld [smem:[#allocation2 + $0x7]]  ;;  %s174_s5 = sld [smem:[#allocation2 + $0x2]]  ;;  %vm115_vm2 = vcmask 998400   ;;  %vm142_vm3 = vcmask 982016   ;;  %vm152_vm4 = vcmask 1039360  }
  0x20   :  { %s251_s1 = smov 124   ;;  %s252_s6 = smov 126  }
  0x21   :  { %s176_s7 = sld [smem:[#allocation2 + $0x4]]  ;;  %s178_s8 = sld [smem:[#allocation2 + $0x6]] }
  0x22   :  { %s253_s9 = smov 122   ;;  %s180_s10 = sld [smem:[#allocation2 + $0x8]] }
  0x23   :  { %s254_s11 = smov 120   ;;  %s173_s12 = sld [smem:[#allocation2 + $0x1]] }
  0x24   :  { %v92_v2 = vstv %s177_s30  ;;  %v65_v4 = vstv %s175_s3  ;;  %s35_s13 = sld [smem:[#allocation2]]  ;;  %s255_s14 = smov 127  }
  0x25   :  { %v93_v3 = vmul.f32 %v92_v2, %v296_v0  ;;  %v66_v5 = vmul.f32 %v65_v4, %v296_v0  ;;  %v94_v6 = vmul.f32 %v92_v2, %v48_v1  ;;  %v67_v7 = vmul.f32 %v65_v4, %v48_v1  ;;  %s256_s15 = smov [#allocation7]  }
  0x26   :  { %v119_v8 = vstv %s179_s4  ;;  %v52_v11 = vstv %s174_s5  ;;  %s163_s16 = sshll.u32 %s256_s15, 4  ;;  %s164_s16 = int_to_ptr.vmem [resolvable:$true] %s163_s16 }
  0x27   :  { %97 = vrot.lane.b32.xlu1 %v93_v3, %s251_s1  ;;  %70 = vrot.lane.b32.xlu0 %v66_v5, %s252_s6  ;;  %v121_v9 = vmul.f32 %v119_v8, %v48_v1  ;;  %v120_v10 = vmul.f32 %v119_v8, %v296_v0  ;;  %v54_v12 = vmul.f32 %v52_v11, %v48_v1  ;;  %v79_v14 = vstv %s176_s7  ;;  %s221_s17 = scalar_lea.vmem %s164_s16, 128  ;;  %p226_p12 = scmp.lt.s32.totalorder %s164_s16, %s164_s16 }
  0x28   :  { %v53_v13 = vmul.f32 %v52_v11, %v296_v0  ;;  %v81_v15 = vmul.f32 %v79_v14, %v48_v1  ;;  %v80_v16 = vmul.f32 %v79_v14, %v296_v0  ;;  %v106_v17 = vstv %s178_s8  ;;  %p222_p11 = scmp.ne.s32.totalorder %s164_s16, %s221_s17  ;;  %p227_p13 = scmp.lt.s32.totalorder %s221_s17, %s221_s17 }
  0x29   :  { %v108_v18 = vmul.f32 %v106_v17, %v48_v1  ;;  %v107_v19 = vmul.f32 %v106_v17, %v296_v0  ;;  %v133_v20 = vstv %s180_s10  ;;  %v49_v23 = vstv %s173_s12 }
  0x2a   :  { %v135_v21 = vmul.f32 %v133_v20, %v48_v1  ;;  %v134_v22 = vmul.f32 %v133_v20, %v296_v0  ;;  %v51_v26 = vmul.f32 %v49_v23, %v48_v1  ;;  %v50_v27 = vmul.f32 %v49_v23, %v296_v0  ;;  %p228_p0 = por %p227_p13, %p226_p12 }
  0x2b   :  { %99 = vrot.lane.b32.xlu1 %v94_v6, %s251_s1  ;;  %72 = vrot.lane.b32.xlu0 %v67_v7, %s252_s6  ;;  %v45_v36 = vstv %s35_s13 }
  0x2c   :  { %v46_v42 = vmul.f32 %v296_v0, %v45_v36  ;;  %p229_p1 = pnand %p228_p0, %p222_p11 }
  0x2f   :  { %126 = vrot.lane.b32.xlu1 %v121_v9, %s253_s9  ;;  %124 = vrot.lane.b32.xlu0 %v120_v10, %s253_s9 }
  0x33   :  { %59 = vrot.lane.b32.xlu1 %v54_v12, %s252_s6  ;;  %57 = vrot.lane.b32.xlu0 %v53_v13, %s252_s6 }
  0x37   :  { %86 = vrot.lane.b32.xlu1 %v81_v15, %s251_s1  ;;  %84 = vrot.lane.b32.xlu0 %v80_v16, %s251_s1 }
  0x3b   :  { %113 = vrot.lane.b32.xlu1 %v108_v18, %s253_s9  ;;  %111 = vrot.lane.b32.xlu0 %v107_v19, %s253_s9 }
  0x3f   :  { %140 = vrot.lane.b32.xlu1 %v135_v21, %s254_s11  ;;  %138 = vrot.lane.b32.xlu0 %v134_v22, %s254_s11 }
  0x99   :  { %v98_v24 = vpop.permute.xlu1 %97  ;;  %v71_v25 = vpop.permute.xlu0 %70 }
  0x9d   :  { %v100_v28 = vpop.permute.xlu1 %99  ;;  %v73_v29 = vpop.permute.xlu0 %72 }
  0x9e   :  { %v74_v30 = vsel %vm61_vm0, %v71_v25, %v73_v29  ;;  %v78_v31 = vadd.f32 %v73_v29, %v51_v26  ;;  %v101_v33 = vsel %vm88_vm1, %v98_v24, %v100_v28 }
  0x9f   :  { %v77_v32 = vadd.f32 %v74_v30, %v50_v27 }
  0xa0   :  { %v105_v35 = vadd.f32 %v100_v28, %v78_v31 }
  0xa1   :  { %v127_v34 = vpop.permute.xlu1 %126  ;;  %v125_v37 = vpop.permute.xlu0 %124  ;;  %v104_v38 = vadd.f32 %v101_v33, %v77_v32 }
  0xa2   :  { %v132_v39 = vadd.f32 %v127_v34, %v105_v35  ;;  %v128_v40 = vsel %vm115_vm2, %v125_v37, %v127_v34 }
  0xa3   :  { %v131_v41 = vadd.f32 %v128_v40, %v104_v38 }
  0xa4   :  { %150 = vrot.lane.b32.xlu1 %v132_v39, %s255_s14 }
  0xa5   :  { %v60_v43 = vpop.permute.xlu1 %59  ;;  %148 = vrot.lane.b32.xlu0 %v131_v41, %s255_s14  ;;  %v58_v44 = vpop.permute.xlu0 %57 }
  0xa6   :  { %v62_v45 = vsel %vm61_vm0, %v58_v44, %v60_v43 }
  0xa7   :  { %v64_v46 = vadd.f32 %v62_v45, %v46_v42 }
  0xa9   :  { %v87_v47 = vpop.permute.xlu1 %86  ;;  %v85_v48 = vpop.permute.xlu0 %84 }
  0xaa   :  { %v89_v49 = vsel %vm88_vm1, %v85_v48, %v87_v47 }
  0xab   :  { %v91_v50 = vadd.f32 %v89_v49, %v64_v46 }
  0xad   :  { %v114_v51 = vpop.permute.xlu1 %113  ;;  %v112_v52 = vpop.permute.xlu0 %111 }
  0xae   :  { %v116_v53 = vsel %vm115_vm2, %v112_v52, %v114_v51 }
  0xaf   :  { %v118_v54 = vadd.f32 %v116_v53, %v91_v50 }
  0xb1   :  { %v141_v55 = vpop.permute.xlu1 %140  ;;  %v139_v56 = vpop.permute.xlu0 %138 }
  0xb2   :  { %v143_v57 = vsel %vm142_vm3, %v139_v56, %v141_v55 }
  0xb3   :  { %v145_v59 = vadd.f32 %v143_v57, %v118_v54 }
 0x116   :  { %v151_v58 = vpop.permute.xlu1 %150 }
 0x117   :  { %v149_v60 = vpop.permute.xlu0 %148 }
 0x118   :  { %v153_v61 = vsel %vm152_vm4, %v149_v60, %v151_v58 }
 0x119   :  { %v155_v62 = vadd.f32 %v153_v61, %v145_v59 }
 0x11b   :  { %156 = vst [vmem:[#allocation7] sm:$0xff] %v155_v62 }
 0x11c   :  { %232 = shalt.err (!%p229_p1)
}
 0x11d   :  { %s233_s20 = scalar_lea.hbm %s327_s2, 128 }
 0x11e   :  { %p234_p2 = scmp.ne.s32.totalorder %s327_s2, %s233_s20  ;;  %p237_p3 = scmp.lt.u32.totalorder %s233_s20, %s327_s2 }
 0x120   :  { %p239_p4 = pnand %p237_p3, %p234_p2 }
 0x122   :  { %242 = shalt.err (!%p239_p4)
}
 0x123   :  { %166 = dma.vmem_to_hbm [thread:$0]  %s164_s16, 128, %s327_s2, [#allocation4]  }
 0x124   :  { %247 = dma.done.wait [#allocation4], 128  }
 0x125   :  { %248 = vsyncadd [#allocation4], 4294967168 }
 0x126   :  { %170 = vsyncpa [#allocation3], 1 }
 0x127   :  { %171 = vsyncpa [#allocation4], 1 }
 0x128   :  { %172 = vsyncpa [#allocation5], 1 }

</bundles_post_ra>
